<compile_context>
chip_gen: v6e
topology: v6e:2x2x1
jax: 0.10.0
libtpu: 0.0.40
codegen_flags: <defaults>
</compile_context>

<pallas_src>
import functools

import jax
import jax.numpy as jnp
from jax.experimental import pallas as pl
from jax.experimental.pallas import tpu as pltpu


def _lora_conv2d_experts_kernel(x_ref, win_ref, wout_ref, out_ref, *, wp, hp):
    """One grid step == Bt images.

    x_ref   : (Bt, KW*C, H*Wp)  compute dtype — width-im2col'd, channel-major,
              flattened spatial in lanes (lane-dense loads).
    win_ref : (E*R, KW*C)       compute dtype — experts stacked on rows.
    wout_ref: (KH, Co, E*R)     f32 — probs folded in (second dot therefore
              also performs the expert-weighted sum), kept f32 so `hidden`
              is consumed without a bf16 re-quantisation.
    out_ref : (Bt, Co, Hp*Wp)   out dtype — channel-major, lane-dense stores.
    """
    bt = x_ref.shape[0]
    kh_taps = wout_ref.shape[0]
    s_out = hp * wp

    win = win_ref[...]
    wout = wout_ref[...]
    for b in range(bt):                         # static unroll; Bt kept small
        # in-conv (1, KW), all experts at once: contract over KW*C.
        hid = jnp.dot(win, x_ref[b],
                      preferred_element_type=jnp.float32)     # (E*R, H*Wp) f32
        # out-conv (KH, 1): per-tap dot accumulated in f32.  Each tap is a
        # contiguous lane window of `hid` (offset kh*Wp) — no concat, no
        # sublane repack.  (On v7x the MRB would absorb these adds for free;
        # on v5e/v6e the VALU has ample slack here.)
        acc = jnp.dot(wout[0], hid[:, :s_out],
                      preferred_element_type=jnp.float32)      # (Co, Hp*Wp) f32
        for kh in range(1, kh_taps):
            acc = acc + jnp.dot(wout[kh], hid[:, kh * wp:kh * wp + s_out],
                                preferred_element_type=jnp.float32)
        out_ref[b] = acc.astype(out_ref.dtype)
    # TODO(synk): optional per-expert bias (has_bias) not implemented (module
    # default bias=False).


def _round_up(v, m):
    return -(-v // m) * m


def _pick_block_batch(n, per_image_bytes, *, budget_bytes=8 << 20, cap=8):
    """Largest divisor of n that keeps the double-buffered per-step blocks
    under `budget_bytes` (well below v7x's 64 MiB VMEM)."""
    fits = [d for d in range(1, n + 1)
            if n % d == 0 and d <= cap and 2 * d * per_image_bytes <= budget_bytes]
    return max(fits) if fits else 1


def lora_conv2d_experts(x, weight_in, weight_out, probs, *,
                        compute_dtype=jnp.bfloat16, out_dtype=None,
                        block_batch=None, data_format="NCHW"):
    """x: (N,C,H,W) [or (N,H,W,C) with data_format='NHWC'];
    weight_in: (E,R,C,1,KW); weight_out: (E,Co,R,KH,1); probs: (E,) — the
    module applies a global scalar probs[e] per expert.
    Returns the mixture output in `data_format`, dtype out_dtype (default
    compute_dtype, i.e. bf16)."""
    if data_format == "NHWC":
        x = jnp.transpose(x, (0, 3, 1, 2))
    n, c, h, w = x.shape
    e, r, c_in, kh_in, kw = weight_in.shape
    e2, co, r2, kh, kw_out = weight_out.shape
    assert (c_in, kh_in) == (c, 1) and (e2, r2, kw_out) == (e, r, 1)
    er = e * r
    wp, hp = w - kw + 1, h - kh + 1
    s_in, s_out = h * wp, hp * wp
    out_dtype = compute_dtype if out_dtype is None else out_dtype

    # Width im2col in XLA (channel-major): xw[n, kw*C + c, h*Wp + w'] =
    # x[n, c, h, w'+kw].  Doing the KW relayout here removes every concat /
    # tile-crossing reshape from the kernel; the trailing flatten is a
    # contiguous reshape (no data movement).
    xc = x.astype(compute_dtype)
    xw = jnp.concatenate([xc[:, :, :, kw_i:kw_i + wp] for kw_i in range(kw)],
                         axis=1)                       # (N, KW*C, H, Wp)
    xw = xw.reshape(n, kw * c, s_in)                   # (N, KW*C, H*Wp)

    # win: (E,R,C,1,KW) -> (E*R, KW*C); row e*R+r, col kw*C+c (experts stacked
    # into the contraction dim).
    win = jnp.transpose(weight_in[:, :, :, 0, :], (0, 1, 3, 2))
    win = win.reshape(er, kw * c).astype(compute_dtype)

    # wout: probs folded in (tiny tensor -> negligible XLA cost, deletes the
    # per-expert full-output multiply); kept f32 for single-rounding accuracy.
    # (E,Co,R,KH,1) -> (KH, Co, E*R); col e*R+r matches win rows.
    wout = weight_out[:, :, :, :, 0].astype(jnp.float32) * \
        probs.astype(jnp.float32)[:, None, None, None]
    wout = jnp.transpose(wout, (3, 1, 0, 2)).reshape(kh, co, er)

    # How many images per grid step (amortise per-step overhead, enlarge DMAs).
    itemsize = jnp.dtype(compute_dtype).itemsize
    per_img = (_round_up(kw * c, 8) * _round_up(s_in, 128) * itemsize
               + _round_up(co, 8) * _round_up(s_out, 128)
               * jnp.dtype(out_dtype).itemsize)
    bt = block_batch if block_batch is not None else _pick_block_batch(n, per_img)
    assert n % bt == 0, (n, bt)

    kernel = functools.partial(_lora_conv2d_experts_kernel, wp=wp, hp=hp)
    out = pl.pallas_call(
        kernel,
        out_shape=jax.ShapeDtypeStruct((n, co, s_out), out_dtype),
        grid=(n // bt,),
        in_specs=[
            pl.BlockSpec((bt, kw * c, s_in), lambda i: (i, 0, 0)),
            pl.BlockSpec((er, kw * c), lambda i: (0, 0)),
            pl.BlockSpec((kh, co, er), lambda i: (0, 0, 0)),
        ],
        out_specs=pl.BlockSpec((bt, co, s_out), lambda i: (i, 0, 0)),
        compiler_params=pltpu.CompilerParams(
            dimension_semantics=("parallel",),     # megacore split on v7x
            vmem_limit_bytes=32 * 1024 * 1024,     # <= half of v7x's 64 MiB
        ),
    )(xw, win, wout)
    # TODO(synk): for N==1 with very large H*W, add an H-tiled grid axis with a
    # (KH-1)-row halo via the index_map so v7x megacore still gets >=2 blocks.

    out = out.reshape(n, co, hp, wp)               # free reshape; already NCHW
    if data_format == "NHWC":
        return jnp.transpose(out, (0, 2, 3, 1))
    return out


def _reference(x_nchw, weight_in, weight_out, probs):
    """Pure-JAX replica of the PyTorch forward (F.conv2d chain per expert)."""
    out = 0.0
    for i in range(weight_in.shape[0]):
        hidden = jax.lax.conv_general_dilated(
            x_nchw, weight_in[i], window_strides=(1, 1), padding="VALID",
            dimension_numbers=("NCHW", "OIHW", "NCHW"))
        o = jax.lax.conv_general_dilated(
            hidden, weight_out[i], window_strides=(1, 1), padding="VALID",
            dimension_numbers=("NCHW", "OIHW", "NCHW"))
        out = out + probs[i] * o
    return out


if __name__ == "__main__":
    # main = nn.Conv2d(4, 8, kernel_size=3, stride=1, padding=0, bias=False)
    N, C_in, C_out, H, W = 2, 4, 8, 16, 16
    num_experts, rank = 3, 4
    KW, KH = 3, 3          # in_kernel_size=(1,3), out_kernel_size=(3,1)

    key = jax.random.PRNGKey(0)
    k_x, k_win, k_wout, k_p = jax.random.split(key, 4)
    x = jax.random.normal(k_x, (N, C_in, H, W), jnp.float32)
    weight_in = 0.1 * jax.random.normal(
        k_win, (num_experts, rank, C_in, 1, KW), jnp.float32)
    weight_out = 0.1 * jax.random.normal(
        k_wout, (num_experts, C_out, rank, KH, 1), jnp.float32)
    probs = jax.nn.softmax(jax.random.normal(k_p, (num_experts,), jnp.float32))

    ref = jax.block_until_ready(_reference(x, weight_in, weight_out, probs))

    # f32 exactness path, block_batch=1 (also exercises the multi-step grid).
    out_f32 = jax.block_until_ready(
        lora_conv2d_experts(x, weight_in, weight_out, probs,
                            compute_dtype=jnp.float32, block_batch=1))
    assert out_f32.shape == (N, C_out, H - KH + 1, W - KW + 1), out_f32.shape
    assert jnp.allclose(out_f32.astype(jnp.float32), ref, atol=1e-4, rtol=1e-4), \
        float(jnp.max(jnp.abs(out_f32.astype(jnp.float32) - ref)))

    # Default bf16-operand / f32-accumulate / bf16-output path (exercises the
    # batched Bt>1 grid step).
    out_bf16 = jax.block_until_ready(
        lora_conv2d_experts(x, weight_in, weight_out, probs))
    assert out_bf16.shape == out_f32.shape, out_bf16.shape
    assert jnp.allclose(out_bf16.astype(jnp.float32), ref, atol=2e-2, rtol=2e-2), \
        float(jnp.max(jnp.abs(out_bf16.astype(jnp.float32) - ref)))

    print("KERNEL_OK")
</pallas_src>

<mosaic_0001>
module attributes {stable_mosaic.version = 11 : i64} {
  func.func @_lora_conv2d_experts_kernel(%arg0: i32, %arg1: memref<1x12x224xf32, #tpu.memory_space<vmem>>, %arg2: memref<12x12xf32, #tpu.memory_space<vmem>>, %arg3: memref<3x8x12xf32, #tpu.memory_space<vmem>>, %arg4: memref<1x8x196xf32, #tpu.memory_space<vmem>>) attributes {dimension_semantics = [#tpu.dimension_semantics<parallel>], iteration_bounds = array<i64: 2>, scalar_prefetch = 0 : i64, scratch_operands = 0 : i64, tpu.core_type = #tpu.core_type<tc>, window_params = [{transform_indices = @transform_0, window_bounds = array<i64: 1, 12, 224>}, {pipeline_mode = #tpu.pipeline_mode<synchronous>, transform_indices = @transform_1, window_bounds = array<i64: 12, 12>}, {pipeline_mode = #tpu.pipeline_mode<synchronous>, transform_indices = @transform_2, window_bounds = array<i64: 3, 8, 12>}, {transform_indices = @transform_3, window_bounds = array<i64: 1, 8, 196>}]} {
    %c0 = arith.constant 0 : index
    %c0_0 = arith.constant 0 : index
    %0 = vector.load %arg2[%c0, %c0_0] : memref<12x12xf32, #tpu.memory_space<vmem>>, vector<12x12xf32>
    %c0_1 = arith.constant 0 : index
    %c0_2 = arith.constant 0 : index
    %c0_3 = arith.constant 0 : index
    %1 = vector.load %arg3[%c0_1, %c0_2, %c0_3] : memref<3x8x12xf32, #tpu.memory_space<vmem>>, vector<3x8x12xf32>
    %c0_4 = arith.constant 0 : index
    %c0_5 = arith.constant 0 : index
    %c0_6 = arith.constant 0 : index
    %2 = vector.load %arg1[%c0_4, %c0_5, %c0_6] : memref<1x12x224xf32, #tpu.memory_space<vmem>>, vector<1x12x224xf32>
    %3 = vector.shape_cast %2 : vector<1x12x224xf32> to vector<12x224xf32>
    %cst = arith.constant dense<0.000000e+00> : vector<12x224xf32>
    %4 = tpu.matmul %0, %3, %cst {dimension_numbers = #tpu.dot_dimension_numbers<[1], [0], [0], [1], [0, 0, 1, 1], [], []>} : vector<12x12xf32>, vector<12x224xf32>, vector<12x224xf32> -> vector<12x224xf32>
    %5 = vector.extract_strided_slice %1 {offsets = [0, 0, 0], sizes = [1, 8, 12], strides = [1, 1, 1]} : vector<3x8x12xf32> to vector<1x8x12xf32>
    %6 = vector.shape_cast %5 : vector<1x8x12xf32> to vector<8x12xf32>
    %7 = vector.extract_strided_slice %4 {offsets = [0, 0], sizes = [12, 196], strides = [1, 1]} : vector<12x224xf32> to vector<12x196xf32>
    %cst_7 = arith.constant dense<0.000000e+00> : vector<8x196xf32>
    %8 = tpu.matmul %6, %7, %cst_7 {dimension_numbers = #tpu.dot_dimension_numbers<[1], [0], [0], [1], [0, 0, 1, 1], [], []>} : vector<8x12xf32>, vector<12x196xf32>, vector<8x196xf32> -> vector<8x196xf32>
    %9 = vector.extract_strided_slice %1 {offsets = [1, 0, 0], sizes = [1, 8, 12], strides = [1, 1, 1]} : vector<3x8x12xf32> to vector<1x8x12xf32>
    %10 = vector.shape_cast %9 : vector<1x8x12xf32> to vector<8x12xf32>
    %11 = vector.extract_strided_slice %4 {offsets = [0, 14], sizes = [12, 196], strides = [1, 1]} : vector<12x224xf32> to vector<12x196xf32>
    %cst_8 = arith.constant dense<0.000000e+00> : vector<8x196xf32>
    %12 = tpu.matmul %10, %11, %cst_8 {dimension_numbers = #tpu.dot_dimension_numbers<[1], [0], [0], [1], [0, 0, 1, 1], [], []>} : vector<8x12xf32>, vector<12x196xf32>, vector<8x196xf32> -> vector<8x196xf32>
    %13 = arith.addf %8, %12 : vector<8x196xf32>
    %14 = vector.extract_strided_slice %1 {offsets = [2, 0, 0], sizes = [1, 8, 12], strides = [1, 1, 1]} : vector<3x8x12xf32> to vector<1x8x12xf32>
    %15 = vector.shape_cast %14 : vector<1x8x12xf32> to vector<8x12xf32>
    %16 = vector.extract_strided_slice %4 {offsets = [0, 28], sizes = [12, 196], strides = [1, 1]} : vector<12x224xf32> to vector<12x196xf32>
    %cst_9 = arith.constant dense<0.000000e+00> : vector<8x196xf32>
    %17 = tpu.matmul %15, %16, %cst_9 {dimension_numbers = #tpu.dot_dimension_numbers<[1], [0], [0], [1], [0, 0, 1, 1], [], []>} : vector<8x12xf32>, vector<12x196xf32>, vector<8x196xf32> -> vector<8x196xf32>
    %18 = arith.addf %13, %17 : vector<8x196xf32>
    %c0_10 = arith.constant 0 : index
    %c0_11 = arith.constant 0 : index
    %c0_12 = arith.constant 0 : index
    %19 = vector.load %arg4[%c0_10, %c0_11, %c0_12] : memref<1x8x196xf32, #tpu.memory_space<vmem>>, vector<1x8x196xf32>
    %20 = vector.shape_cast %19 : vector<1x8x196xf32> to vector<8x196xf32>
    %21 = vector.shape_cast %18 : vector<8x196xf32> to vector<1x8x196xf32>
    tpu.vector_store %arg4[%c0_10, %c0_11, %c0_12], %21 {strides = array<i32>} : memref<1x8x196xf32, #tpu.memory_space<vmem>>, vector<1x8x196xf32>,
    return
  }
  func.func @transform_0(%arg0: i32) -> (i32, i32, i32) {
    %c0_i32 = arith.constant 0 : i32
    %c0_i32_0 = arith.constant 0 : i32
    %c0_i32_1 = arith.constant 0 : i32
    return %arg0, %c0_i32, %c0_i32_0 : i32, i32, i32
  }
  func.func @transform_1(%arg0: i32) -> (i32, i32) {
    %c0_i32 = arith.constant 0 : i32
    %c0_i32_0 = arith.constant 0 : i32
    %c0_i32_1 = arith.constant 0 : i32
    return %c0_i32, %c0_i32_0 : i32, i32
  }
  func.func @transform_2(%arg0: i32) -> (i32, i32, i32) {
    %c0_i32 = arith.constant 0 : i32
    %c0_i32_0 = arith.constant 0 : i32
    %c0_i32_1 = arith.constant 0 : i32
    %c0_i32_2 = arith.constant 0 : i32
    return %c0_i32, %c0_i32_0, %c0_i32_1 : i32, i32, i32
  }
  func.func @transform_3(%arg0: i32) -> (i32, i32, i32) {
    %c0_i32 = arith.constant 0 : i32
    %c0_i32_0 = arith.constant 0 : i32
    %c0_i32_1 = arith.constant 0 : i32
    return %arg0, %c0_i32, %c0_i32_0 : i32, i32, i32
  }
}

</mosaic_0001>

<bundles_post_ra>
// kernel: tpu_custom_call.1
= control target key start
LH: loop header
LB: loop body
LE: loop exit
PB: predicated region body
PF: predicated region fallthrough
CT: control target
= control target key end

     0   :  { %8 = vsyncpa [#allocation3], 0  ;;  %s884_s0 = inlined_call_operand.vmem [shape: f32[2,12,224], index: 0, kind: input, shape index: {}]   ;;  %s885_s1 = inlined_call_operand.vmem [shape: f32[12,12], index: 1, kind: input, shape index: {}]   ;;  %s886_s2 = inlined_call_operand.vmem [shape: f32[3,8,12], index: 2, kind: input, shape index: {}]   ;;  %s887_s3 = inlined_call_operand.hbm [shape: f32[2,8,196], index: 3, kind: output, shape index: {}]  }
   0x1   :  { %10 = vsyncpa [#allocation3 + $0x1], 0  ;;  %s767_s12 = smov 0   ;;  %s769_s13 = smov 0  }
   0x2   :  { %s771_s14 = smov 0   ;;  %s773_s15 = smov 0  }
   0x3 LB: > { %s788_s16 = sadd.s32 4294967295, %s741_s15   ;;  %s612_s17 = sadd.s32 4294967294, %s741_s15   ;;  %s741_s15 = sphi %s773_s15, %s893_s15   ;;  %s737_s14 = sphi %s771_s14, %s892_s14   ;;  %s733_s13 = sphi %s769_s13, %s891_s13   ;;  %s729_s12 = sphi %s767_s12, %s890_s12  }
   0x4   : > { %s792_s18 = sadd.s32 1, %s741_s15   ;;  %s91_s19 = sadd.s32 1, %s737_s14 }
   0x5   : > { %s88_s20 = ssub.s32 %s741_s15, %s792_s18  ;;  %p101_p0 = scmp.ne.s32.totalorder %s737_s14, %s733_s13 }
   0x6   : > { %p89_p1 = scmp.eq.s32.totalorder %s88_s20, 0  ;;  %p102_p2 = scmp.eq.s32.totalorder %s788_s16, 1 }
   0x7   : > { %p107_p3 = scmp.ne.s32.totalorder %s733_s13, %s729_s12  ;;  %p108_p4 = scmp.eq.s32.totalorder %s612_s17, 1 }
   0x8   : > { %s803_s21 = scalar_select %p89_p1, %s737_s14, %s91_s19  }
   0x9   : > { %p805_p5 = por %p102_p2, %p101_p0  ;;  %p809_p6 = por %p108_p4, %p107_p3 }
   0xa   : > { %p615_p7 = scmp.ge.s32.totalorder %s741_s15, 1  ;;  %p140_p8 = scmp.lt.s32.totalorder %s741_s15, 3 }
   0xc   : > { %p141_p9 = pnand %p615_p7, %p140_p8 }
   0xd   : > { %p164_p10 = scmp.lt.s32.totalorder (!%p141_p9), %s788_s16, 1  ;;  %s744_s6 = smov (!%p141_p9), 114  }
   0xe   : > { %144 = sbr.rel (%p141_p9) target bundleno = 564 (0x234), region = 32  ;;  %s745_s7 = smov (!%p141_p9), 100  }
   0xf   : > { %s161_s20 = sand.u32 (!%p141_p9), 1, %s733_s13  }
  0x10   : > { %s539_s4 = scalar_lea.sflag (!%p141_p9), [#allocation3], %s161_s20 }
  0x13   : > { %v743_v0 = vmov 0.0   ;;  %s165_s24 = scalar_select %p164_p10, %s788_s16, 1  ;;  %vm185_vm0 = vcmask 1043456   ;;  %v169_v5 = vld [vmem:[%s885_s1] sm:$0xff]  ;;  %vm178_vm1 = vcmask 97280   ;;  %vm281_vm2 = vcmask 932864  }
  0x14   : > { %256 = vmatprep.mubr.f32.mxu0 %v743_v0  ;;  %357 = vmatprep.mubr.f32.mxu1 %v743_v0  ;;  %v170_v6 = vld [vmem:[%s885_s1 + $0x8] sm:$0xf]  ;;  %vm450_vm3 = vcmask 818176   ;;  %v171_v22 = vld [vmem:[%s886_s2] sm:$0xff]  ;;  %v173_v24 = vld [vmem:[%s886_s2 + $0x10] sm:$0xff]  ;;  %vm536_vm4 = vcmask 556032  }
  0x15   : > { %s637_s25 = sshll.u32 %s165_s24, 5  ;;  %v172_v17 = vld [vmem:[%s886_s2 + $0x8] sm:$0xff]  ;;  %s616_s24 = sshll.u32 %s161_s20, 4 }
  0x16   : > { %s168_s28 = scalar_lea.vmem %s884_s0, %s637_s25  ;;  %s638_s25 = sshll.u32 %s788_s16, 8 }
  0x17   : > { %v177_v1 = vld [vmem:[%s168_s28 + $0x18] sm:$0xf]  ;;  %v176_v2 = vld [vmem:[%s168_s28 + $0x10] sm:$0xf]  ;;  %v175_v3 = vld [vmem:[%s168_s28 + $0x8] sm:$0xff]  ;;  %s163_s26 = scalar_lea.vmem [#allocation2], %s616_s24  ;;  %s551_s30 = scalar_lea.hbm %s887_s3, %s638_s25 }
  0x18   : > { %619 = vmatprep.subr.msk.mxu0 %vm185_vm0, %v177_v1  ;;  %v174_v4 = vld [vmem:[%s168_s28] sm:$0xff]  ;;  %s553_s27 = sshll.u32 %s163_s26, 4  ;;  %s746_s16 = smov [#allocation2]   ;;  %s554_s27 = int_to_ptr.vmem [resolvable:$true] %s553_s27 }
  0x19   : > { %620 = vmatpush1.msk.msra.mxu0 %vm185_vm0, %v176_v2  ;;  %s681_s5 = scalar_lea.vmem %s554_s27, 256 }
  0x1a   : > { %222 = vmatprep.subr.mxu0 %v175_v3  ;;  %p682_p11 = scmp.ne.s32.totalorder %s554_s27, %s681_s5 }
  0x1b   : > { %223 = vmatpush1.msra.mxu0 %v174_v4 }
  0x1c   : > { %621 = vmatmul.mubr.msk.f32.vlgmr.msra.gmra.mxu0 %vm178_vm1, %v169_v5  ;;  %p683_p12 = pnand %p682_p11, %p805_p5 }
  0x1d   : > { %262 = vmatprep.mubr.f32.mxu0 %v743_v0 }
  0x1e   : > { %p684_p13 = pneg %p683_p12 }
  0x20   : > { %622 = vmatmul.mubr.msk.f32.gmra.mxu0 %vm178_vm1, %v170_v6 }
  0x21   : > { %526 = vmatprep.mubr.f32.mxu0 %v743_v0 }
  0xdc   : > { %v258_v7 = vpop.f32.mrf.mxu0 }
  0xdd   : > { %273 = vrot.lane.b32.xlu1 %v258_v7, %s744_s6 }
  0xde   : > { %v260_v8 = vpop.f32.mrf.mxu0 }
  0xe0   : > { %v264_v9 = vpop.f32.mrf.mxu0 }
  0xe1   : > { %275 = vrot.lane.b32.xlu1 %v260_v8, %s744_s6  ;;  %277 = vrot.lane.b32.xlu0 %v264_v9, %s744_s6 }
  0xe2   : > { %v266_v10 = vpop.f32.mrf.mxu0 }
  0xe5   : > { %448 = vrot.lane.b32.xlu1 %v266_v10, %s745_s7  ;;  %279 = vrot.lane.b32.xlu0 %v266_v10, %s744_s6  ;;  %s685_s6 = sshll.u32 %s746_s16, 4  ;;  %s686_s6 = int_to_ptr.vmem [resolvable:$false] %s685_s6 }
  0xe6   : > { %p688_p0 = scmp.lt.s32.totalorder %s554_s27, %s686_s6 }
  0xe9   : > { %444 = vrot.lane.b32.xlu1 %v260_v8, %s745_s7  ;;  %446 = vrot.lane.b32.xlu0 %v264_v9, %s745_s7 }
  0xed   : > { %442 = vrot.lane.b32.xlu0 %v258_v7, %s745_s7  ;;  %s687_s7 = scalar_lea.vmem %s686_s6, 512 }
  0xee   : > { %p689_p1 = scmp.lt.s32.totalorder %s687_s7, %s681_s5 }
  0xf0   : > { %p690_p2 = por %p689_p1, %p688_p0 }
  0xf2   : > { %p691_p3 = pnand %p690_p2, %p684_p13 }
 0x14f   : > { %v274_v11 = vpop.permute.xlu1 %273 }
 0x153   : > { %v276_v12 = vpop.permute.xlu1 %275  ;;  %v278_v13 = vpop.permute.xlu0 %277 }
 0x154   : > { %v282_v18 = vsel %vm281_vm2, %v274_v11, %v276_v12 }
 0x157   : > { %v449_v14 = vpop.permute.xlu1 %448  ;;  %v280_v15 = vpop.permute.xlu0 %279 }
 0x158   : > { %623 = vmatprep.subr.msk.mxu1 %vm185_vm0, %v280_v15  ;;  %629 = vmatprep.subr.msk.mxu0 %vm185_vm0, %v449_v14  ;;  %v283_v16 = vsel %vm281_vm2, %v278_v13, %v280_v15 }
 0x159   : > { %624 = vmatpush1.msk.msra.mxu1 %vm185_vm0, %v283_v16 }
 0x15a   : > { %323 = vmatprep.subr.mxu1 %v276_v12 }
 0x15b   : > { %324 = vmatpush1.msra.mxu1 %v282_v18  ;;  %v447_v19 = vpop.permute.xlu0 %446  ;;  %v445_v21 = vpop.permute.xlu1 %444 }
 0x15c   : > { %v452_v20 = vsel %vm450_vm3, %v447_v19, %v449_v14  ;;  %625 = vmatmul.mubr.msk.f32.vlgmr.msra.gmra.mxu1 %vm178_vm1, %v172_v17  ;;  %626 = vmatprep.subr.msk.mxu1 %vm185_vm0, %v266_v10 }
 0x15d   : > { %627 = vmatpush1.msk.msra.mxu1 %vm185_vm0, %v264_v9  ;;  %630 = vmatpush1.msk.msra.mxu0 %vm185_vm0, %v452_v20 }
 0x15e   : > { %401 = vmatprep.subr.mxu1 %v260_v8  ;;  %492 = vmatprep.subr.mxu0 %v445_v21 }
 0x15f   : > { %402 = vmatpush1.msra.mxu1 %v258_v7  ;;  %435 = vmatprep.mubr.f32.mxu1 %v743_v0  ;;  %v443_v23 = vpop.permute.xlu0 %442 }
 0x160   : > { %v451_v25 = vsel %vm450_vm3, %v443_v23, %v445_v21  ;;  %628 = vmatmul.mubr.msk.f32.vlgmr.msra.gmra.mxu1 %vm178_vm1, %v171_v22 }
 0x161   : > { %493 = vmatpush1.msra.mxu0 %v451_v25 }
 0x162   : > { %631 = vmatmul.mubr.msk.f32.vlgmr.msra.gmra.mxu0 %vm178_vm1, %v173_v24 }
 0x21c   : > { %v359_v26 = vpop.f32.mrf.mxu1 }
 0x21e   : > { %v361_v27 = vpop.f32.mrf.mxu1 }
 0x220   : > { %v437_v28 = vpop.f32.mrf.mxu1 }
 0x221   : > { %v438_v29 = vadd.f32 %v437_v28, %v359_v26 }
 0x222   : > { %v439_v30 = vpop.f32.mrf.mxu1  ;;  %v528_v31 = vpop.f32.mrf.mxu0 }
 0x223   : > { %v440_v32 = vadd.f32 %v439_v30, %v361_v27  ;;  %v533_v33 = vadd.f32 %v528_v31, %v438_v29 }
 0x224   : > { %v530_v34 = vpop.f32.mrf.mxu0 }
 0x225   : > { %535 = vst [vmem:[%s163_s26] sm:$0xff] %v533_v33  ;;  %v534_v35 = vadd.f32 %v530_v34, %v440_v32 }
 0x227   : > { %537 = vst.msk [vmem:[%s163_s26 + $0x8] sm:$0xff] %vm536_vm4, %v534_v35 }
 0x228   : > { %694 = shalt.err (!%p691_p3)
}
 0x229   : > { %s695_s8 = scalar_lea.hbm %s551_s30, 256  ;;  %s699_s11 = scalar_lea.hbm %s887_s3, 512 }
 0x22a   : > { %p696_p4 = scmp.ne.s32.totalorder %s551_s30, %s695_s8  ;;  %p700_p9 = scmp.lt.s32.totalorder %s551_s30, %s887_s3 }
 0x22b   : > { %p701_p10 = scmp.lt.s32.totalorder %s699_s11, %s695_s8 }
 0x22c   : > { %p697_p7 = pnand %p696_p4, %p805_p5 }
 0x22d   : > { %p702_p11 = por %p701_p10, %p700_p9 }
 0x22e   : > { %p698_p8 = pneg %p697_p7 }
 0x230   : > { %p703_p12 = pnand %p702_p11, %p698_p8 }
 0x232   : > { %706 = shalt.err (!%p703_p12)
}
 0x233   : > { %639 = dma.vmem_to_hbm [thread:$0]  (%p805_p5), %s554_s27, 256, %s551_s30, %s539_s4  }
 0x234 PF: > { %p645_p13 = scmp.ge.s32.totalorder %s741_s15, 2  ;;  %s565_s20 = sand.u32 1, %s729_s12  }
 0x235   : > { %s566_s24 = scalar_lea.sflag [#allocation3], %s565_s20 }
 0x236   : > { %p642_p0 = pnand %p645_p13, %p809_p6 }
 0x238   : > { %p643_p1 = pneg %p642_p0 }
 0x23a   : > { %724 = dma.done.wait (%p643_p1), %s566_s24, 256  }
 0x23b   : > { %726 = vsyncadd (%p643_p1), %s566_s24, 4294967040  ;;  %p13_p2 = scmp.ge.s32.totalorder %s792_s18, 4   ;;  %s890_s12 = smov %s733_s13 }
 0x23c   : > { %s891_s13 = smov %s737_s14  ;;  %s892_s14 = smov %s803_s21 }
 0x23d   : > { %s893_s15 = smov %s792_s18  ;;  %15 = sbr.rel (!%p13_p2) target bundleno = 3 (0x3), region = 67 }
 0x242   :  { %571 = vsyncpa [#allocation3], 1 }
 0x243   :  { %573 = vsyncpa [#allocation3 + $0x1], 1 }

</bundles_post_ra>
